<compile_context>
chip_gen: v6e
topology: v6e:2x2x1
jax: 0.10.0
libtpu: 0.0.40
codegen_flags: <defaults>
</compile_context>

<pallas_src>
import functools
import math

import jax
import jax.numpy as jnp
from jax.experimental import pallas as pl
from jax.experimental.pallas import tpu as pltpu


# ----------------------------- Pallas kernel --------------------------------

def _critic_mlp_kernel(state_ref, action_ref, w1s_ref, w1a_ref, b1_ref,
                       w2_ref, b2_ref, w3_ref, b3_ref, q_ref,
                       *, out_on_vpu, compute_dtype):
    cd = compute_dtype

    # Layer 1: fused concat -> two MXU matmuls sharing the f32 accumulator.
    s = state_ref[...].astype(cd)
    a = action_ref[...].astype(cd)
    h1 = jnp.dot(s, w1s_ref[...].astype(cd), preferred_element_type=jnp.float32)
    h1 = h1 + jnp.dot(a, w1a_ref[...].astype(cd),
                      preferred_element_type=jnp.float32)
    h1 = jnp.maximum(h1 + b1_ref[...], 0.0)                     # (TB, F) f32

    # Layer 2.
    h2 = jnp.dot(h1.astype(cd), w2_ref[...].astype(cd),
                 preferred_element_type=jnp.float32)
    h2 = jnp.maximum(h2 + b2_ref[...], 0.0)                     # (TB, F) f32

    # Layer 3.
    if out_on_vpu:
        # n_out == 1: w3_ref is the single row (1, F); VPU mul + lane reduce
        # beats a 1-column MXU pass.
        q = jnp.sum(h2 * w3_ref[...], axis=-1, keepdims=True) + b3_ref[...]
    else:
        # General n_out: w3_ref is (n_out, F); contract over F on the MXU.
        q = jax.lax.dot_general(h2.astype(cd), w3_ref[...].astype(cd),
                                (((1,), (1,)), ((), ())),
                                preferred_element_type=jnp.float32)
        q = q + b3_ref[...]

    q_ref[...] = q.astype(q_ref.dtype)


# ------------------------------ wrapper --------------------------------------

def critic_forward(state, action, params, *, block_b=256,
                   compute_dtype=jnp.float32):
    """Pallas-backed forward pass of CriticNetwork.

    state:  (B, n_state)
    action: (B, n_action)
    returns q with all size-1 dims squeezed (matches torch.squeeze).
    """
    w1s, w1a, b1 = params["w1s"], params["w1a"], params["b1"]
    w2, b2 = params["w2"], params["b2"]
    w3, b3 = params["w3"], params["b3"]          # w3: (n_out, F), b3: (1, n_out)

    # `.float()` semantics from the PyTorch module.
    state = state.astype(jnp.float32)
    action = action.astype(jnp.float32)

    B, n_state = state.shape
    n_action = action.shape[1]
    n_out = w3.shape[0]
    out_on_vpu = (n_out == 1)

    # Batch tiling: single full-batch block for small B, otherwise `block_b`
    # row tiles (multiple of 8) with weights resident across the whole grid.
    if B <= block_b:
        tb, num_blocks, b_pad = B, 1, B
    else:
        tb = block_b
        num_blocks = pl.cdiv(B, tb)
        b_pad = num_blocks * tb
        if b_pad != B:
            pad = ((0, b_pad - B), (0, 0))
            state = jnp.pad(state, pad)
            action = jnp.pad(action, pad)

    act_spec = lambda n: pl.BlockSpec((tb, n), lambda i: (i, 0))
    res_spec = lambda arr: pl.BlockSpec(arr.shape, lambda i: (0, 0))  # resident

    kernel = functools.partial(_critic_mlp_kernel,
                               out_on_vpu=out_on_vpu,
                               compute_dtype=compute_dtype)

    q = pl.pallas_call(
        kernel,
        out_shape=jax.ShapeDtypeStruct((b_pad, n_out), jnp.float32),
        grid=(num_blocks,),
        in_specs=[act_spec(n_state), act_spec(n_action),
                  res_spec(w1s), res_spec(w1a), res_spec(b1),
                  res_spec(w2), res_spec(b2),
                  res_spec(w3), res_spec(b3)],
        out_specs=pl.BlockSpec((tb, n_out), lambda i: (i, 0)),
        compiler_params=pltpu.CompilerParams(
            dimension_semantics=("parallel",)),
    )(state, action, w1s, w1a, b1, w2, b2, w3, b3)

    if b_pad != B:
        q = q[:B]

    # torch.squeeze(q): drops ALL size-1 dims (same footgun as PyTorch at B==1).
    return jnp.squeeze(q)


# --------------------------- parameter init ----------------------------------

def init_critic_params(key, n_state, n_action, n_features, n_output):
    """Weights stored as (in, out) [except w3: (n_out, F)], biases as (1, F)."""
    k1, k2, k3, kb1, kb2, kb3 = jax.random.split(key, 6)
    n_input = n_state + n_action
    relu_gain = math.sqrt(2.0)   # nn.init.calculate_gain('relu')
    lin_gain = 1.0               # nn.init.calculate_gain('linear')

    def xavier(key, fan_in, fan_out, gain, shape):
        # U(-a, a), a = gain * sqrt(6 / (fan_in + fan_out)); symmetric, so the
        # (in, out) transpose of the PyTorch layout is distribution-identical.
        a = gain * math.sqrt(6.0 / (fan_in + fan_out))
        return jax.random.uniform(key, shape, jnp.float32, -a, a)

    def linear_bias(key, fan_in, n):
        # PyTorch nn.Linear default bias init: U(-1/sqrt(fan_in), 1/sqrt(fan_in))
        bound = 1.0 / math.sqrt(fan_in)
        return jax.random.uniform(key, (1, n), jnp.float32, -bound, bound)

    # Layer-1 weight drawn jointly over (n_input, F) then split along the
    # input dim so the state/action concat is fused into the kernel.
    w1 = xavier(k1, n_input, n_features, relu_gain, (n_input, n_features))
    return {
        "w1s": w1[:n_state],                                     # (n_state, F)
        "w1a": w1[n_state:],                                     # (n_action, F)
        "b1": linear_bias(kb1, n_input, n_features),             # (1, F)
        "w2": xavier(k2, n_features, n_features, relu_gain,
                     (n_features, n_features)),                  # (F, F)
        "b2": linear_bias(kb2, n_features, n_features),          # (1, F)
        "w3": xavier(k3, n_features, n_output, lin_gain,
                     (n_output, n_features)),                    # (n_out, F)
        "b3": linear_bias(kb3, n_features, n_output),            # (1, n_out)
    }


# --------------------------------- demo --------------------------------------

if __name__ == "__main__":
    key = jax.random.PRNGKey(0)
    k_p, k_s, k_a = jax.random.split(key, 3)

    batch = 8
    n_state = 6
    n_action = 2
    n_features = 32
    n_output = 1

    params = init_critic_params(k_p, n_state, n_action, n_features, n_output)

    state = jax.random.normal(k_s, (batch, n_state), jnp.float32)
    action = jax.random.normal(k_a, (batch, n_action), jnp.float32)

    fwd = jax.jit(critic_forward)
    q = fwd(state, action, params)
    q = jax.block_until_ready(q)

    # Pure-JAX reference check (re-assemble the split/transposed weights).
    w1 = jnp.concatenate([params["w1s"], params["w1a"]], axis=0)
    sa = jnp.concatenate([state, action], axis=1)
    f1 = jnp.maximum(sa @ w1 + params["b1"], 0.0)
    f2 = jnp.maximum(f1 @ params["w2"] + params["b2"], 0.0)
    q_ref = jnp.squeeze(f2 @ params["w3"].T + params["b3"])

    assert q.shape == (batch,), q.shape
    assert jnp.allclose(q, q_ref, atol=1e-5, rtol=1e-5)

    print("KERNEL_OK")
</pallas_src>

<mosaic_0001>
module attributes {stable_mosaic.version = 11 : i64} {
  func.func @_critic_mlp_kernel(%arg0: i32, %arg1: memref<8x6xf32, #tpu.memory_space<vmem>>, %arg2: memref<8x2xf32, #tpu.memory_space<vmem>>, %arg3: memref<6x32xf32, #tpu.memory_space<vmem>>, %arg4: memref<2x32xf32, #tpu.memory_space<vmem>>, %arg5: memref<1x32xf32, #tpu.memory_space<vmem>>, %arg6: memref<32x32xf32, #tpu.memory_space<vmem>>, %arg7: memref<1x32xf32, #tpu.memory_space<vmem>>, %arg8: memref<1x32xf32, #tpu.memory_space<vmem>>, %arg9: memref<1x1xf32, #tpu.memory_space<vmem>>, %arg10: memref<8x1xf32, #tpu.memory_space<vmem>>) attributes {dimension_semantics = [#tpu.dimension_semantics<parallel>], iteration_bounds = array<i64: 1>, scalar_prefetch = 0 : i64, scratch_operands = 0 : i64, tpu.core_type = #tpu.core_type<tc>, window_params = [{transform_indices = @transform_0, window_bounds = array<i64: 8, 6>}, {transform_indices = @transform_1, window_bounds = array<i64: 8, 2>}, {pipeline_mode = #tpu.pipeline_mode<synchronous>, transform_indices = @transform_2, window_bounds = array<i64: 6, 32>}, {pipeline_mode = #tpu.pipeline_mode<synchronous>, transform_indices = @transform_3, window_bounds = array<i64: 2, 32>}, {pipeline_mode = #tpu.pipeline_mode<synchronous>, transform_indices = @transform_4, window_bounds = array<i64: 1, 32>}, {pipeline_mode = #tpu.pipeline_mode<synchronous>, transform_indices = @transform_5, window_bounds = array<i64: 32, 32>}, {pipeline_mode = #tpu.pipeline_mode<synchronous>, transform_indices = @transform_6, window_bounds = array<i64: 1, 32>}, {pipeline_mode = #tpu.pipeline_mode<synchronous>, transform_indices = @transform_7, window_bounds = array<i64: 1, 32>}, {pipeline_mode = #tpu.pipeline_mode<synchronous>, transform_indices = @transform_8, window_bounds = array<i64: 1, 1>}, {transform_indices = @transform_9, window_bounds = array<i64: 8, 1>}]} {
    %c0 = arith.constant 0 : index
    %c0_0 = arith.constant 0 : index
    %0 = vector.load %arg1[%c0, %c0_0] : memref<8x6xf32, #tpu.memory_space<vmem>>, vector<8x6xf32>
    %c0_1 = arith.constant 0 : index
    %c0_2 = arith.constant 0 : index
    %1 = vector.load %arg2[%c0_1, %c0_2] : memref<8x2xf32, #tpu.memory_space<vmem>>, vector<8x2xf32>
    %c0_3 = arith.constant 0 : index
    %c0_4 = arith.constant 0 : index
    %2 = vector.load %arg3[%c0_3, %c0_4] : memref<6x32xf32, #tpu.memory_space<vmem>>, vector<6x32xf32>
    %cst = arith.constant dense<0.000000e+00> : vector<8x32xf32>
    %3 = tpu.matmul %0, %2, %cst {dimension_numbers = #tpu.dot_dimension_numbers<[1], [0], [0], [1], [0, 0, 1, 1], [], []>} : vector<8x6xf32>, vector<6x32xf32>, vector<8x32xf32> -> vector<8x32xf32>
    %c0_5 = arith.constant 0 : index
    %c0_6 = arith.constant 0 : index
    %4 = vector.load %arg4[%c0_5, %c0_6] : memref<2x32xf32, #tpu.memory_space<vmem>>, vector<2x32xf32>
    %cst_7 = arith.constant dense<0.000000e+00> : vector<8x32xf32>
    %5 = tpu.matmul %1, %4, %cst_7 {dimension_numbers = #tpu.dot_dimension_numbers<[1], [0], [0], [1], [0, 0, 1, 1], [], []>} : vector<8x2xf32>, vector<2x32xf32>, vector<8x32xf32> -> vector<8x32xf32>
    %6 = arith.addf %3, %5 : vector<8x32xf32>
    %c0_8 = arith.constant 0 : index
    %c0_9 = arith.constant 0 : index
    %7 = vector.load %arg5[%c0_8, %c0_9] : memref<1x32xf32, #tpu.memory_space<vmem>>, vector<1x32xf32>
    %8 = vector.broadcast %7 : vector<1x32xf32> to vector<8x32xf32>
    %9 = arith.addf %6, %8 : vector<8x32xf32>
    %cst_10 = arith.constant 0.000000e+00 : f32
    %10 = vector.broadcast %cst_10 : f32 to vector<8x32xf32>
    %11 = arith.maximumf %9, %10 : vector<8x32xf32>
    %c0_11 = arith.constant 0 : index
    %c0_12 = arith.constant 0 : index
    %12 = vector.load %arg6[%c0_11, %c0_12] : memref<32x32xf32, #tpu.memory_space<vmem>>, vector<32x32xf32>
    %cst_13 = arith.constant dense<0.000000e+00> : vector<8x32xf32>
    %13 = tpu.matmul %11, %12, %cst_13 {dimension_numbers = #tpu.dot_dimension_numbers<[1], [0], [0], [1], [0, 0, 1, 1], [], []>} : vector<8x32xf32>, vector<32x32xf32>, vector<8x32xf32> -> vector<8x32xf32>
    %c0_14 = arith.constant 0 : index
    %c0_15 = arith.constant 0 : index
    %14 = vector.load %arg7[%c0_14, %c0_15] : memref<1x32xf32, #tpu.memory_space<vmem>>, vector<1x32xf32>
    %15 = vector.broadcast %14 : vector<1x32xf32> to vector<8x32xf32>
    %16 = arith.addf %13, %15 : vector<8x32xf32>
    %cst_16 = arith.constant 0.000000e+00 : f32
    %17 = vector.broadcast %cst_16 : f32 to vector<8x32xf32>
    %18 = arith.maximumf %16, %17 : vector<8x32xf32>
    %c0_17 = arith.constant 0 : index
    %c0_18 = arith.constant 0 : index
    %19 = vector.load %arg8[%c0_17, %c0_18] : memref<1x32xf32, #tpu.memory_space<vmem>>, vector<1x32xf32>
    %20 = vector.broadcast %19 : vector<1x32xf32> to vector<8x32xf32>
    %21 = arith.mulf %18, %20 : vector<8x32xf32>
    %cst_19 = arith.constant dense<0.000000e+00> : vector<8xf32>
    %22 = vector.multi_reduction <add>, %21, %cst_19 [1] : vector<8x32xf32> to vector<8xf32>
    %23 = vector.shape_cast %22 : vector<8xf32> to vector<8x1xf32>
    %c0_20 = arith.constant 0 : index
    %c0_21 = arith.constant 0 : index
    %24 = vector.load %arg9[%c0_20, %c0_21] : memref<1x1xf32, #tpu.memory_space<vmem>>, vector<1x1xf32>
    %25 = vector.broadcast %24 : vector<1x1xf32> to vector<8x1xf32>
    %26 = arith.addf %23, %25 : vector<8x1xf32>
    %c0_22 = arith.constant 0 : index
    %c0_23 = arith.constant 0 : index
    %27 = vector.load %arg10[%c0_22, %c0_23] : memref<8x1xf32, #tpu.memory_space<vmem>>, vector<8x1xf32>
    tpu.vector_store %arg10[%c0_22, %c0_23], %26 {strides = array<i32>} : memref<8x1xf32, #tpu.memory_space<vmem>>, vector<8x1xf32>,
    return
  }
  func.func @transform_0(%arg0: i32) -> (i32, i32) {
    %c0_i32 = arith.constant 0 : i32
    %c0_i32_0 = arith.constant 0 : i32
    return %arg0, %c0_i32 : i32, i32
  }
  func.func @transform_1(%arg0: i32) -> (i32, i32) {
    %c0_i32 = arith.constant 0 : i32
    %c0_i32_0 = arith.constant 0 : i32
    return %arg0, %c0_i32 : i32, i32
  }
  func.func @transform_2(%arg0: i32) -> (i32, i32) {
    %c0_i32 = arith.constant 0 : i32
    %c0_i32_0 = arith.constant 0 : i32
    %c0_i32_1 = arith.constant 0 : i32
    return %c0_i32, %c0_i32_0 : i32, i32
  }
  func.func @transform_3(%arg0: i32) -> (i32, i32) {
    %c0_i32 = arith.constant 0 : i32
    %c0_i32_0 = arith.constant 0 : i32
    %c0_i32_1 = arith.constant 0 : i32
    return %c0_i32, %c0_i32_0 : i32, i32
  }
  func.func @transform_4(%arg0: i32) -> (i32, i32) {
    %c0_i32 = arith.constant 0 : i32
    %c0_i32_0 = arith.constant 0 : i32
    %c0_i32_1 = arith.constant 0 : i32
    return %c0_i32, %c0_i32_0 : i32, i32
  }
  func.func @transform_5(%arg0: i32) -> (i32, i32) {
    %c0_i32 = arith.constant 0 : i32
    %c0_i32_0 = arith.constant 0 : i32
    %c0_i32_1 = arith.constant 0 : i32
    return %c0_i32, %c0_i32_0 : i32, i32
  }
  func.func @transform_6(%arg0: i32) -> (i32, i32) {
    %c0_i32 = arith.constant 0 : i32
    %c0_i32_0 = arith.constant 0 : i32
    %c0_i32_1 = arith.constant 0 : i32
    return %c0_i32, %c0_i32_0 : i32, i32
  }
  func.func @transform_7(%arg0: i32) -> (i32, i32) {
    %c0_i32 = arith.constant 0 : i32
    %c0_i32_0 = arith.constant 0 : i32
    %c0_i32_1 = arith.constant 0 : i32
    return %c0_i32, %c0_i32_0 : i32, i32
  }
  func.func @transform_8(%arg0: i32) -> (i32, i32) {
    %c0_i32 = arith.constant 0 : i32
    %c0_i32_0 = arith.constant 0 : i32
    %c0_i32_1 = arith.constant 0 : i32
    return %c0_i32, %c0_i32_0 : i32, i32
  }
  func.func @transform_9(%arg0: i32) -> (i32, i32) {
    %c0_i32 = arith.constant 0 : i32
    %c0_i32_0 = arith.constant 0 : i32
    return %arg0, %c0_i32 : i32, i32
  }
}

</mosaic_0001>

<bundles_post_ra>
// kernel: critic_forward.1
= control target key start
LH: loop header
LB: loop body
LE: loop exit
PB: predicated region body
PF: predicated region fallthrough
CT: control target
= control target key end

     0   :  { %s517_s0 = inlined_call_operand.vmem [shape: f32[8,6], index: 0, kind: input, shape index: {}]   ;;  %s518_s1 = inlined_call_operand.vmem [shape: f32[8,2], index: 1, kind: input, shape index: {}]   ;;  %s519_s2 = inlined_call_operand.vmem [shape: f32[6,32], index: 2, kind: input, shape index: {}]   ;;  %s520_s3 = inlined_call_operand.vmem [shape: f32[2,32], index: 3, kind: input, shape index: {}]   ;;  %s521_s4 = inlined_call_operand.vmem [shape: f32[1,32], index: 4, kind: input, shape index: {}]   ;;  %s522_s5 = inlined_call_operand.hbm [shape: f32[32,32], index: 5, kind: input, shape index: {}]   ;;  %s523_s6 = inlined_call_operand.hbm [shape: f32[1,32], index: 6, kind: input, shape index: {}]   ;;  %s524_s7 = inlined_call_operand.vmem [shape: f32[1,32], index: 7, kind: input, shape index: {}]   ;;  %s525_s8 = inlined_call_operand.<no memory space> [shape: f32[1,1], index: 8, kind: input, shape index: {}]   ;;  %s526_s9 = inlined_call_operand.vmem [shape: f32[8,1], index: 9, kind: output, shape index: {}]  }
   0x1   :  { %v14_v0 = vstv %s525_s8 }
   0x2   :  { %15 = vst [vmem:[#allocation2] sm:$0x1] %v14_v0 }
   0x3   :  { %16 = vsyncpa [#allocation4], 0 }
   0x4   :  { %17 = vsyncpa [#allocation6], 0  ;;  %s431_s11 = smov [#allocation3]  }
   0x5   :  { %s33_s12 = sshll.u32 %s431_s11, 4  ;;  %s34_s12 = int_to_ptr.vmem [resolvable:$true] %s33_s12 }
   0x6   :  { %s395_s13 = scalar_lea.vmem %s34_s12, 512  ;;  %p400_p1 = scmp.lt.s32.totalorder %s34_s12, %s34_s12 }
   0x7   :  { %p396_p0 = scmp.ne.s32.totalorder %s34_s12, %s395_s13  ;;  %p401_p2 = scmp.lt.s32.totalorder %s395_s13, %s395_s13 }
   0x9   :  { %p402_p3 = por %p401_p2, %p400_p1 }
   0xb   :  { %p403_p4 = pnand %p402_p3, %p396_p0 }
   0xd   :  { %406 = shalt.err (!%p403_p4)
}
   0xe   :  { %s432_s14 = smov 128   ;;  %s433_s15 = smov 8  }
   0xf   :  { %39 = dma.hbm_to_vmem [thread:$0]  %s522_s5, 512, %s34_s12, [#allocation4], %s432_s14, %s432_s14, %s433_s15  }
  0x10   :  { %s434_s8 = smov [#allocation5]  }
  0x11   :  { %s46_s18 = sshll.u32 %s434_s8, 4  ;;  %s47_s18 = int_to_ptr.vmem [resolvable:$true] %s46_s18 }
  0x12   :  { %s415_s19 = scalar_lea.vmem %s47_s18, 16  ;;  %s419_s20 = scalar_lea.vmem %s47_s18, 32 }
  0x13   :  { %p416_p5 = scmp.ne.s32.totalorder %s47_s18, %s415_s19  ;;  %p420_p6 = scmp.lt.s32.totalorder %s47_s18, %s47_s18 }
  0x14   :  { %p421_p7 = scmp.lt.s32.totalorder %s419_s20, %s415_s19 }
  0x16   :  { %p422_p8 = por %p421_p7, %p420_p6 }
  0x18   :  { %p423_p9 = pnand %p422_p8, %p416_p5 }
  0x1a   :  { %426 = shalt.err (!%p423_p9)
}
  0x1b   :  { %49 = dma.hbm_to_vmem [thread:$0]  %s523_s6, 16, %s47_s18, [#allocation6]  }
  0x1c   :  { %427 = dma.done.wait [#allocation4], 512  }
  0x1d   :  { %428 = vsyncadd [#allocation4], 4294966784 }
  0x1e   :  { %429 = dma.done.wait [#allocation6], 16  }
  0x1f   :  { %430 = vsyncadd [#allocation6], 4294967280  ;;  %v435_v1 = vmov 0.0   ;;  %vm436_vm0 = vmmov 0   ;;  %vm68_vm1 = vcmask 1041408   ;;  %vm64_vm2 = vcmask 15360  }
  0x20   :  { %360 = vmatprep.subr.mxu1 %v435_v1  ;;  %362 = vmatprep.mubr.msk.f32.mxu1 %vm436_vm0, %v435_v1  ;;  %v63_v2 = vld [vmem:[%s520_s3] sm:$0x3]  ;;  %vm146_vm3 = vcmask 1045504   ;;  %vm142_vm4 = vcmask 48128   ;;  %v231_v7 = vld [vmem:[#allocation3 + $0x10] sm:$0xff]  ;;  %v230_v8 = vld [vmem:[#allocation3 + $0x8] sm:$0xff] }
  0x21   :  { %370 = vmatprep.subr.mxu0 %v435_v1  ;;  %378 = vmatprep.mubr.msk.f32.mxu0 %vm436_vm0, %v435_v1  ;;  %v61_v3 = vld [vmem:[%s518_s1] sm:$0xff]  ;;  %vm240_vm5 = vcmask 261120   ;;  %vm334_vm6 = vcmask 7168  }
  0x22   :  { %v62_v4 = vld [vmem:[%s519_s2] sm:$0x3f]  ;;  %361 = vmatpush3.msk.msra.mxu1 %vm68_vm1, %v63_v2 }
  0x23   :  { %363 = vmatmul.mubr.msk.f32.vlgmr.msra.gmra.mxu1 %vm64_vm2, %v61_v3  ;;  %365 = vmatprep.subr.mxu1 %v435_v1  ;;  %v60_v5 = vld [vmem:[%s517_s0] sm:$0xff] }
  0x24   :  { %366 = vmatpush3.msk.msra.mxu1 %vm146_vm3, %v62_v4  ;;  %367 = vmatprep.mubr.msk.f32.mxu1 %vm436_vm0, %v435_v1  ;;  %v232_v6 = vld [vmem:[#allocation3 + $0x18] sm:$0xff]  ;;  %v229_v9 = vld [vmem:[#allocation3] sm:$0xff] }
  0x25   :  { %371 = vmatpush3.msra.mxu0 %v232_v6  ;;  %v346_v13 = vld [vmem:[%s521_s4] ss:$0 sm:$0xff]  ;;  %v347_v18 = vld [vmem:[#allocation5] ss:$0 sm:$0xff] }
  0x26   :  { %372 = vmatprep.subr.mxu0 %v435_v1  ;;  %v349_v22 = vld [vmem:[%s524_s7] ss:$0 sm:$0xff] }
  0x27   :  { %368 = vmatmul.mubr.msk.f32.vlgmr.msra.gmra.mxu1 %vm142_vm4, %v60_v5  ;;  %373 = vmatpush3.msra.mxu0 %v231_v7  ;;  %v350_v26 = vld [vmem:[#allocation2] ss:$0 sm:$0xff] }
  0x28   :  { %374 = vmatprep.subr.mxu0 %v435_v1 }
  0x29   :  { %375 = vmatpush3.msra.mxu0 %v230_v8 }
  0x2a   :  { %376 = vmatprep.subr.mxu0 %v435_v1 }
  0x2b   :  { %377 = vmatpush3.msra.mxu0 %v229_v9 }
  0xe3   :  { %v138_v10 = vpop.f32.mrf.mxu1 }
  0xe5   :  { %v364_v11 = vpop.f32.mrf.mxu1 }
  0xe7   :  { %v216_v12 = vpop.f32.mrf.mxu1 }
  0xe8   :  { %v217_v14 = vadd.f32 %v216_v12, %v138_v10 }
  0xe9   :  { %v369_v15 = vpop.f32.mrf.mxu1 }
  0xea   :  { %v227_v16 = vadd.f32 %v346_v13, %v217_v14 }
  0xec   :  { %v228_v17 = vmax.f32 %v227_v16, 0.0 }
  0xee   :  { %379 = vmatmul.mubr.msk.f32.vlgmr.msra.gmra.mxu0 %vm240_vm5, %v228_v17 }
 0x1ae   :  { %v310_v19 = vpop.f32.mrf.mxu0 }
 0x1af   :  { %v311_v20 = vadd.f32 %v347_v18, %v310_v19 }
 0x1b0   :  { %v380_v21 = vpop.f32.mrf.mxu0 }
 0x1b1   :  { %v314_v23 = vmax.f32 %v311_v20, 0.0 }
 0x1b3   :  { %v322_v24 = vmul.f32 %v349_v22, %v314_v23 }
 0x1b5   :  { %v323_v25 = vsel %vm240_vm5, %v322_v24, 0.0 }
 0x1b6   :  { %324 = vadd.xlane.f32.xlu0 %v323_v25 }
 0x23f   :  { %v325_v27 = vpop.xlane.xlu0 %324 }
 0x240   :  { %v333_v28 = vadd.f32 %v350_v26, %v325_v27 }
 0x242   :  { %335 = vst.msk [vmem:[%s526_s9] sm:$0xff] %vm334_vm6, %v333_v28 }
 0x243   :  { %340 = vsyncpa [#allocation4], 1 }
 0x244   :  { %341 = vsyncpa [#allocation6], 1 }

</bundles_post_ra>
